<compile_context>
chip_gen: v7x
topology: tpu7x:2x2x1
jax: 0.10.0
libtpu: 0.0.40
codegen_flags: <defaults>
</compile_context>

<pallas_src>
import functools

import jax
import jax.numpy as jnp
from jax.experimental import pallas as pl
from jax.experimental.pallas import tpu as pltpu


def _mt0_kernel(tok_ref, mask_ref, w1_ref, b1_ref, w2t_ref, b2_ref,
                out_ref, acc_ref, den_ref, *, seq_len, ts, ragged_s, pool_dtype):
    # tok_ref:  [TB, TS, H]   streamed last_hidden_state tile (f32 or bf16)
    # mask_ref: [TB, 1, TS]   f32 scores = attentions[-1][:, 0, :, 0]
    # w1_ref:   [H, H1]   b1_ref: [1, H1]   w2t_ref: [1, H1]   b2_ref: [1, 1]
    # out_ref:  [1, TB, 1]
    # acc_ref:  [TB, 1, H] f32 scratch (masked-sum accumulator)
    # den_ref:  [TB, 1]    f32 scratch (mask-sum accumulator)
    si = pl.program_id(1)

    @pl.when(si == 0)
    def _init():
        acc_ref[...] = jnp.zeros_like(acc_ref)
        den_ref[...] = jnp.zeros_like(den_ref)

    tok = tok_ref[...]                          # [TB, TS, H]
    mask = mask_ref[...]                        # [TB, 1, TS], f32

    if ragged_s:
        # Last sequence tile is partial: out-of-bounds reads hold stale VMEM
        # data, so guard both operands (select, not multiply, so NaNs can't
        # leak). VPU has ample slack in this HBM-bound kernel.
        base = si * ts
        pos_t = jax.lax.broadcasted_iota(jnp.int32, (1, ts, 1), 1) + base
        tok = jnp.where(pos_t < seq_len, tok, jnp.zeros((), tok.dtype))
        pos_m = jax.lax.broadcasted_iota(jnp.int32, (1, 1, ts), 2) + base
        mask = jnp.where(pos_m < seq_len, mask, 0.0)

    # Masked sum over this sequence tile as a batched MXU contraction
    # ([1, TS] @ [TS, H] per batch row); bf16 operands, f32 accumulation.
    acc_ref[...] += jnp.einsum(
        "bks,bsh->bkh", mask.astype(pool_dtype), tok.astype(pool_dtype),
        preferred_element_type=jnp.float32)      # [TB, 1, H]
    den_ref[...] += jnp.sum(mask, axis=2)        # [TB, 1], f32

    # Epilogue: finish pooling + MLP + sigmoid once per batch tile.
    @pl.when(si == pl.num_programs(1) - 1)
    def _finish():
        denom = jnp.maximum(den_ref[...], 1e-9)           # torch.clamp(min=1e-9)
        pooled = acc_ref[...][:, 0, :] / denom            # [TB, H], f32
        # dropout_input / trailing dropout: identity in eval mode.
        h = jnp.dot(pooled, w1_ref[...].astype(jnp.float32),
                    preferred_element_type=jnp.float32)
        h = jnp.tanh(h + b1_ref[...].astype(jnp.float32))          # hidden_act
        # Second Linear (out_features == 1): VPU multiply + lane reduce.
        logits = (jnp.sum(h * w2t_ref[...].astype(jnp.float32),
                          axis=-1, keepdims=True)
                  + b2_ref[...].astype(jnp.float32))
        out_ref[...] = (jax.nn.sigmoid(logits) * 100.0)[None]      # [1, TB, 1]


def _vmem_budget_bytes():
    # Budget for the double-buffered token_embeddings tiles; scale with the
    # generation's VMEM (v5e/v6e: 128 MiB -> 48 MiB; v7x: 64 MiB -> 24 MiB).
    try:
        cap = int(pltpu.get_tpu_info().vmem_capacity_bytes)
        return max(8 << 20, min(48 << 20, (cap * 3) // 8))
    except Exception:
        return 24 << 20


def mt0_regressor_forward(token_embeddings, attention_scores, w1, b1, w2, b2,
                          *, tb=None, ts=None, pool_dtype=jnp.bfloat16):
    """Pallas forward for the post-encoder part of MT0Regressor.

    token_embeddings: [B, S, H]  (pass bf16 encoder output straight through to
                                  halve HBM streaming; f32 also supported)
    attention_scores: [B, S]     (attentions[-1][:, 0, :, 0])
    w1: [H, H1]  b1: [H1]/[1,H1]  w2: [H1, 1]  b2: [1]/[1,1]
    Returns logits [B, 1] f32.
    """
    B, S, H = token_embeddings.shape
    H1 = w1.shape[1]

    # >= 2 batch tiles for B >= 2 so the "parallel" axis shards across both
    # v7x TensorCores; cap at 8 rows per tile.
    if tb is None:
        tb = max(1, min(8, -(-B // 2)))
    if ts is None:
        item = jnp.dtype(token_embeddings.dtype).itemsize
        cap = _vmem_budget_bytes() // max(1, 2 * tb * H * item)
        cap = max(128, min(2048, (cap // 128) * 128))
        ts = S if S <= cap else cap
    assert tb >= 1 and ts >= 1
    # Mask block last dim must be lane-legal: multiple of 128 or the full S.
    assert ts == S or ts % 128 == 0, "ts must equal S or be a multiple of 128"

    n_bt = -(-B // tb)
    n_st = -(-S // ts)
    ragged_s = (n_st * ts != S)

    # Tiny [B, 1, S] mask; no padding/copies of the big [B, S, H] tensor.
    mask3 = attention_scores.reshape(B, 1, S).astype(jnp.float32)
    w1 = jnp.asarray(w1)                      # keep input dtype (no f32 upcast)
    b1 = jnp.asarray(b1).reshape(1, H1)
    w2t = jnp.asarray(w2).reshape(1, H1)      # [H1, 1] -> [1, H1]
    b2 = jnp.asarray(b2).reshape(1, 1)

    kernel = functools.partial(_mt0_kernel, seq_len=S, ts=ts,
                               ragged_s=ragged_s, pool_dtype=pool_dtype)

    tok_item = jnp.dtype(token_embeddings.dtype).itemsize
    w_item = jnp.dtype(w1.dtype).itemsize

    def build(single_buffer_weights):
        def const_spec(shape):
            nd = len(shape)
            idx = lambda bi, si: (0,) * nd
            if single_buffer_weights:
                # Constant block index -> one VMEM buffer is enough.
                return pl.BlockSpec(shape, idx, pipeline_mode=pl.Buffered(1))
            return pl.BlockSpec(shape, idx)

        wbuf = 1 if single_buffer_weights else 2
        need = (2 * tb * ts * H * tok_item                 # tok double buffer
                + 2 * tb * 8 * ts * 4                      # mask double buffer
                + wbuf * (H * H1 + 2 * H1 + 1) * w_item    # weights
                + tb * 8 * H * 4 + tb * 8 * 128 * 4        # f32 accumulators
                + (8 << 20))                               # headroom
        vmem_limit = int(min(max(need, 32 << 20), 96 << 20))

        return pl.pallas_call(
            kernel,
            out_shape=jax.ShapeDtypeStruct((n_bt, tb, 1), jnp.float32),
            grid_spec=pltpu.PrefetchScalarGridSpec(
                num_scalar_prefetch=0,
                grid=(n_bt, n_st),
                in_specs=[
                    pl.BlockSpec((tb, ts, H), lambda bi, si: (bi, si, 0)),  # tok
                    pl.BlockSpec((tb, 1, ts), lambda bi, si: (bi, 0, si)),  # mask
                    const_spec((H, H1)),                                    # w1
                    const_spec((1, H1)),                                    # b1
                    const_spec((1, H1)),                                    # w2^T
                    const_spec((1, 1)),                                     # b2
                ],
                out_specs=pl.BlockSpec((1, tb, 1), lambda bi, si: (bi, 0, 0)),
                scratch_shapes=[
                    pltpu.VMEM((tb, 1, H), jnp.float32),   # masked-sum acc
                    pltpu.VMEM((tb, 1), jnp.float32),      # mask-sum acc
                ]),
            compiler_params=pltpu.CompilerParams(
                dimension_semantics=("parallel", "arbitrary"),
                vmem_limit_bytes=vmem_limit),
        )

    args = (token_embeddings, mask3, w1, b1, w2t, b2)
    try:
        out = build(True)(*args)
    except Exception:
        # Fallback if this Pallas version rejects pipeline_mode / Buffered(1).
        out = build(False)(*args)

    # Rows beyond B (ragged last batch tile) are garbage by construction.
    return out.reshape(n_bt * tb, 1)[:B]


def reference_forward(token_embeddings, attention_scores, w1, b1, w2, b2):
    tok = token_embeddings.astype(jnp.float32)
    mask = attention_scores.astype(jnp.float32)[:, :, None]
    pooled = (tok * mask).sum(1) / jnp.maximum(mask.sum(1), 1e-9)
    h = jnp.tanh(pooled @ w1.astype(jnp.float32)
                 + b1.astype(jnp.float32).reshape(1, -1))
    logits = h @ w2.astype(jnp.float32) + b2.astype(jnp.float32).reshape(1, 1)
    return jax.nn.sigmoid(logits) * 100.0


if __name__ == "__main__":
    key = jax.random.PRNGKey(0)
    k_tok, k_att, k_w1, k_b1, k_w2, k_b2, k_rest = jax.random.split(key, 7)

    # --- Test 1: small f32 case, strict parity (f32 pooling), default tiles ---
    B, S, H, H1 = 2, 8, 32, 16
    tok = jax.random.normal(k_tok, (B, S, H), jnp.float32)
    att = jax.nn.softmax(jax.random.normal(k_att, (B, S), jnp.float32), axis=-1)
    lim1 = 1.0 / (H ** 0.5)
    lim2 = 1.0 / (H1 ** 0.5)
    w1 = jax.random.uniform(k_w1, (H, H1), jnp.float32, -lim1, lim1)
    b1 = jax.random.uniform(k_b1, (1, H1), jnp.float32, -lim1, lim1)
    w2 = jax.random.uniform(k_w2, (H1, 1), jnp.float32, -lim2, lim2)
    b2 = jax.random.uniform(k_b2, (1, 1), jnp.float32, -lim2, lim2)

    out = mt0_regressor_forward(tok, att, w1, b1, w2, b2,
                                pool_dtype=jnp.float32)
    jax.block_until_ready(out)
    ref = reference_forward(tok, att, w1, b1, w2, b2)
    assert out.shape == (B, 1)
    assert jnp.allclose(out, ref, atol=5e-4, rtol=1e-4), (out, ref)

    # --- Test 2: multi-tile ragged grid (B=10 -> ragged batch tile, S=250 with
    #     ts=128 -> ragged sequence tile), f32 stream, bf16 pooling (default) ---
    B2, S2, H2, H12 = 10, 250, 128, 32
    kk = jax.random.split(k_rest, 6)
    tok2 = jax.random.normal(kk[0], (B2, S2, H2), jnp.float32)
    att2 = jax.nn.softmax(jax.random.normal(kk[1], (B2, S2), jnp.float32), -1)
    l1 = 1.0 / (H2 ** 0.5)
    l2 = 1.0 / (H12 ** 0.5)
    w1b = jax.random.uniform(kk[2], (H2, H12), jnp.float32, -l1, l1)
    b1b = jax.random.uniform(kk[3], (1, H12), jnp.float32, -l1, l1)
    w2b = jax.random.uniform(kk[4], (H12, 1), jnp.float32, -l2, l2)
    b2b = jax.random.uniform(kk[5], (1, 1), jnp.float32, -l2, l2)

    out2 = mt0_regressor_forward(tok2, att2, w1b, b1b, w2b, b2b, tb=8, ts=128)
    jax.block_until_ready(out2)
    ref2 = reference_forward(tok2, att2, w1b, b1b, w2b, b2b)
    assert out2.shape == (B2, 1)
    assert jnp.allclose(out2, ref2, atol=1.0, rtol=0.05), (out2, ref2)

    # --- Test 3: bf16 streaming + bf16 weights, default tiles (tb=5 -> two
    #     batch tiles with tb not a multiple of 8; single full-extent S tile) ---
    out3 = mt0_regressor_forward(
        tok2.astype(jnp.bfloat16), att2,
        w1b.astype(jnp.bfloat16), b1b.astype(jnp.bfloat16),
        w2b.astype(jnp.bfloat16), b2b.astype(jnp.bfloat16))
    jax.block_until_ready(out3)
    assert out3.shape == (B2, 1)
    assert jnp.allclose(out3, ref2, atol=1.0, rtol=0.05), (out3, ref2)

    print("KERNEL_OK")
</pallas_src>

<mosaic_0001>
module attributes {stable_mosaic.version = 11 : i64} {
  func.func @_mt0_kernel(%arg0: i32, %arg1: i32, %arg2: memref<1x8x32xf32, #tpu.memory_space<vmem>>, %arg3: memref<1x1x8xf32, #tpu.memory_space<vmem>>, %arg4: memref<32x16xf32, #tpu.memory_space<vmem>>, %arg5: memref<1x16xf32, #tpu.memory_space<vmem>>, %arg6: memref<1x16xf32, #tpu.memory_space<vmem>>, %arg7: memref<1x1xf32, #tpu.memory_space<vmem>>, %arg8: memref<1x1x1xf32, #tpu.memory_space<vmem>>, %arg9: memref<1x1x32xf32, #tpu.memory_space<vmem>>, %arg10: memref<1x1xf32, #tpu.memory_space<vmem>>) attributes {dimension_semantics = [#tpu.dimension_semantics<parallel>, #tpu.dimension_semantics<arbitrary>], iteration_bounds = array<i64: 2, 1>, scalar_prefetch = 0 : i64, scratch_operands = 2 : i64, tpu.core_type = #tpu.core_type<tc>, window_params = [{transform_indices = @transform_0, window_bounds = array<i64: 1, 8, 32>}, {transform_indices = @transform_1, window_bounds = array<i64: 1, 1, 8>}, {pipeline_mode = #tpu.pipeline_mode<synchronous>, transform_indices = @transform_2, window_bounds = array<i64: 32, 16>}, {pipeline_mode = #tpu.pipeline_mode<synchronous>, transform_indices = @transform_3, window_bounds = array<i64: 1, 16>}, {pipeline_mode = #tpu.pipeline_mode<synchronous>, transform_indices = @transform_4, window_bounds = array<i64: 1, 16>}, {pipeline_mode = #tpu.pipeline_mode<synchronous>, transform_indices = @transform_5, window_bounds = array<i64: 1, 1>}, {transform_indices = @transform_6, window_bounds = array<i64: 1, 1, 1>}]} {
    %c0_i32 = arith.constant 0 : i32
    %0 = arith.cmpi eq, %arg1, %c0_i32 : i32
    %1 = arith.extui %0 : i1 to i32
    %c0_i32_0 = arith.constant 0 : i32
    %2 = arith.cmpi ne, %1, %c0_i32_0 : i32
    scf.if %2 {
      %cst_19 = arith.constant 0.000000e+00 : f32
      %16 = vector.broadcast %cst_19 : f32 to vector<1x1x32xf32>
      %c0_20 = arith.constant 0 : index
      %c0_21 = arith.constant 0 : index
      %c0_22 = arith.constant 0 : index
      %17 = vector.load %arg9[%c0_20, %c0_21, %c0_22] : memref<1x1x32xf32, #tpu.memory_space<vmem>>, vector<1x1x32xf32>
      tpu.vector_store %arg9[%c0_20, %c0_21, %c0_22], %16 {strides = array<i32>} : memref<1x1x32xf32, #tpu.memory_space<vmem>>, vector<1x1x32xf32>,
      %cst_23 = arith.constant 0.000000e+00 : f32
      %18 = vector.broadcast %cst_23 : f32 to vector<1x1xf32>
      %c0_24 = arith.constant 0 : index
      %c0_25 = arith.constant 0 : index
      %19 = vector.load %arg10[%c0_24, %c0_25] : memref<1x1xf32, #tpu.memory_space<vmem>>, vector<1x1xf32>
      tpu.vector_store %arg10[%c0_24, %c0_25], %18 {strides = array<i32>} : memref<1x1xf32, #tpu.memory_space<vmem>>, vector<1x1xf32>,
    } else {
    }
    %c0 = arith.constant 0 : index
    %c0_1 = arith.constant 0 : index
    %c0_2 = arith.constant 0 : index
    %3 = vector.load %arg2[%c0, %c0_1, %c0_2] : memref<1x8x32xf32, #tpu.memory_space<vmem>>, vector<1x8x32xf32>
    %c0_3 = arith.constant 0 : index
    %c0_4 = arith.constant 0 : index
    %c0_5 = arith.constant 0 : index
    %4 = vector.load %arg3[%c0_3, %c0_4, %c0_5] : memref<1x1x8xf32, #tpu.memory_space<vmem>>, vector<1x1x8xf32>
    %c0_6 = arith.constant 0 : index
    %c0_7 = arith.constant 0 : index
    %c0_8 = arith.constant 0 : index
    %5 = vector.load %arg9[%c0_6, %c0_7, %c0_8] : memref<1x1x32xf32, #tpu.memory_space<vmem>>, vector<1x1x32xf32>
    "tpu.trace_start"() <{level = 10 : i32, message = "bks,bsh->bkh"}> : () -> ()
    %cst = arith.constant dense<0.000000e+00> : vector<1x1x32xf32>
    %6 = tpu.matmul %4, %3, %cst {dimension_numbers = #tpu.dot_dimension_numbers<[2], [1], [1], [2], [0, 0, 0, 1, 1, 2], [0], [0]>} : vector<1x1x8xf32>, vector<1x8x32xf32>, vector<1x1x32xf32> -> vector<1x1x32xf32>
    "tpu.trace_stop"() : () -> ()
    %7 = arith.addf %5, %6 : vector<1x1x32xf32>
    %c0_9 = arith.constant 0 : index
    %c0_10 = arith.constant 0 : index
    %c0_11 = arith.constant 0 : index
    %8 = vector.load %arg9[%c0_9, %c0_10, %c0_11] : memref<1x1x32xf32, #tpu.memory_space<vmem>>, vector<1x1x32xf32>
    tpu.vector_store %arg9[%c0_9, %c0_10, %c0_11], %7 {strides = array<i32>} : memref<1x1x32xf32, #tpu.memory_space<vmem>>, vector<1x1x32xf32>,
    %c0_12 = arith.constant 0 : index
    %c0_13 = arith.constant 0 : index
    %9 = vector.load %arg10[%c0_12, %c0_13] : memref<1x1xf32, #tpu.memory_space<vmem>>, vector<1x1xf32>
    %cst_14 = arith.constant dense<0.000000e+00> : vector<1x1xf32>
    %10 = vector.multi_reduction <add>, %4, %cst_14 [2] : vector<1x1x8xf32> to vector<1x1xf32>
    %11 = arith.addf %9, %10 : vector<1x1xf32>
    %c0_15 = arith.constant 0 : index
    %c0_16 = arith.constant 0 : index
    %12 = vector.load %arg10[%c0_15, %c0_16] : memref<1x1xf32, #tpu.memory_space<vmem>>, vector<1x1xf32>
    tpu.vector_store %arg10[%c0_15, %c0_16], %11 {strides = array<i32>} : memref<1x1xf32, #tpu.memory_space<vmem>>, vector<1x1xf32>,
    %c0_i32_17 = arith.constant 0 : i32
    %13 = arith.cmpi eq, %arg1, %c0_i32_17 : i32
    %14 = arith.extui %13 : i1 to i32
    %c0_i32_18 = arith.constant 0 : i32
    %15 = arith.cmpi ne, %14, %c0_i32_18 : i32
    scf.if %15 {
      %c0_19 = arith.constant 0 : index
      %c0_20 = arith.constant 0 : index
      %16 = vector.load %arg10[%c0_19, %c0_20] : memref<1x1xf32, #tpu.memory_space<vmem>>, vector<1x1xf32>
      %cst_21 = arith.constant 9.99999971E-10 : f32
      %17 = vector.broadcast %cst_21 : f32 to vector<1x1xf32>
      %18 = arith.maximumf %16, %17 : vector<1x1xf32>
      %c0_22 = arith.constant 0 : index
      %c0_23 = arith.constant 0 : index
      %c0_24 = arith.constant 0 : index
      %19 = vector.load %arg9[%c0_22, %c0_23, %c0_24] : memref<1x1x32xf32, #tpu.memory_space<vmem>>, vector<1x1x32xf32>
      %20 = vector.shape_cast %19 : vector<1x1x32xf32> to vector<1x32xf32>
      %21 = vector.broadcast %18 : vector<1x1xf32> to vector<1x32xf32>
      %22 = arith.divf %20, %21 : vector<1x32xf32>
      %c0_25 = arith.constant 0 : index
      %c0_26 = arith.constant 0 : index
      %23 = vector.load %arg4[%c0_25, %c0_26] : memref<32x16xf32, #tpu.memory_space<vmem>>, vector<32x16xf32>
      %cst_27 = arith.constant dense<0.000000e+00> : vector<1x16xf32>
      %24 = tpu.matmul %22, %23, %cst_27 {dimension_numbers = #tpu.dot_dimension_numbers<[1], [0], [0], [1], [0, 0, 1, 1], [], []>} : vector<1x32xf32>, vector<32x16xf32>, vector<1x16xf32> -> vector<1x16xf32>
      %c0_28 = arith.constant 0 : index
      %c0_29 = arith.constant 0 : index
      %25 = vector.load %arg5[%c0_28, %c0_29] : memref<1x16xf32, #tpu.memory_space<vmem>>, vector<1x16xf32>
      %26 = arith.addf %24, %25 : vector<1x16xf32>
      %27 = math.tanh %26 : vector<1x16xf32>
      %c0_30 = arith.constant 0 : index
      %c0_31 = arith.constant 0 : index
      %28 = vector.load %arg6[%c0_30, %c0_31] : memref<1x16xf32, #tpu.memory_space<vmem>>, vector<1x16xf32>
      %29 = arith.mulf %27, %28 : vector<1x16xf32>
      %cst_32 = arith.constant dense<0.000000e+00> : vector<1xf32>
      %30 = vector.multi_reduction <add>, %29, %cst_32 [1] : vector<1x16xf32> to vector<1xf32>
      %31 = vector.shape_cast %30 : vector<1xf32> to vector<1x1xf32>
      %c0_33 = arith.constant 0 : index
      %c0_34 = arith.constant 0 : index
      %32 = vector.load %arg7[%c0_33, %c0_34] : memref<1x1xf32, #tpu.memory_space<vmem>>, vector<1x1xf32>
      %33 = arith.addf %31, %32 : vector<1x1xf32>
      %34 = arith.negf %33 : vector<1x1xf32>
      %35 = math.exp %34 : vector<1x1xf32>
      %cst_35 = arith.constant 1.000000e+00 : f32
      %36 = vector.broadcast %cst_35 : f32 to vector<1x1xf32>
      %37 = arith.addf %36, %35 : vector<1x1xf32>
      %38 = arith.divf %36, %37 : vector<1x1xf32>
      %cst_36 = arith.constant 1.000000e+02 : f32
      %39 = vector.broadcast %cst_36 : f32 to vector<1x1xf32>
      %40 = arith.mulf %38, %39 : vector<1x1xf32>
      %41 = vector.shape_cast %40 : vector<1x1xf32> to vector<1x1x1xf32>
      %c0_37 = arith.constant 0 : index
      %c0_38 = arith.constant 0 : index
      %c0_39 = arith.constant 0 : index
      %42 = vector.load %arg8[%c0_37, %c0_38, %c0_39] : memref<1x1x1xf32, #tpu.memory_space<vmem>>, vector<1x1x1xf32>
      tpu.vector_store %arg8[%c0_37, %c0_38, %c0_39], %41 {strides = array<i32>} : memref<1x1x1xf32, #tpu.memory_space<vmem>>, vector<1x1x1xf32>,
    } else {
    }
    return
  }
  func.func @transform_0(%arg0: i32, %arg1: i32) -> (i32, i32, i32) {
    %c0_i32 = arith.constant 0 : i32
    %c0_i32_0 = arith.constant 0 : i32
    return %arg0, %arg1, %c0_i32 : i32, i32, i32
  }
  func.func @transform_1(%arg0: i32, %arg1: i32) -> (i32, i32, i32) {
    %c0_i32 = arith.constant 0 : i32
    %c0_i32_0 = arith.constant 0 : i32
    return %arg0, %c0_i32, %arg1 : i32, i32, i32
  }
  func.func @transform_2(%arg0: i32, %arg1: i32) -> (i32, i32) {
    %c0_i32 = arith.constant 0 : i32
    %c0_i32_0 = arith.constant 0 : i32
    %c0_i32_1 = arith.constant 0 : i32
    return %c0_i32, %c0_i32_0 : i32, i32
  }
  func.func @transform_3(%arg0: i32, %arg1: i32) -> (i32, i32) {
    %c0_i32 = arith.constant 0 : i32
    %c0_i32_0 = arith.constant 0 : i32
    %c0_i32_1 = arith.constant 0 : i32
    return %c0_i32, %c0_i32_0 : i32, i32
  }
  func.func @transform_4(%arg0: i32, %arg1: i32) -> (i32, i32) {
    %c0_i32 = arith.constant 0 : i32
    %c0_i32_0 = arith.constant 0 : i32
    %c0_i32_1 = arith.constant 0 : i32
    return %c0_i32, %c0_i32_0 : i32, i32
  }
  func.func @transform_5(%arg0: i32, %arg1: i32) -> (i32, i32) {
    %c0_i32 = arith.constant 0 : i32
    %c0_i32_0 = arith.constant 0 : i32
    %c0_i32_1 = arith.constant 0 : i32
    return %c0_i32, %c0_i32_0 : i32, i32
  }
  func.func @transform_6(%arg0: i32, %arg1: i32) -> (i32, i32, i32) {
    %c0_i32 = arith.constant 0 : i32
    %c0_i32_0 = arith.constant 0 : i32
    %c0_i32_1 = arith.constant 0 : i32
    return %arg0, %c0_i32, %c0_i32_0 : i32, i32, i32
  }
}

module attributes {stable_mosaic.version = 11 : i64} {
  func.func @_mt0_kernel(%arg0: i32, %arg1: i32, %arg2: memref<1x8x32xf32, #tpu.memory_space<vmem>>, %arg3: memref<1x1x8xf32, #tpu.memory_space<vmem>>, %arg4: memref<32x16xf32, #tpu.memory_space<vmem>>, %arg5: memref<1x16xf32, #tpu.memory_space<vmem>>, %arg6: memref<1x16xf32, #tpu.memory_space<vmem>>, %arg7: memref<1x1xf32, #tpu.memory_space<vmem>>, %arg8: memref<1x1x1xf32, #tpu.memory_space<vmem>>, %arg9: memref<1x1x32xf32, #tpu.memory_space<vmem>>, %arg10: memref<1x1xf32, #tpu.memory_space<vmem>>) attributes {dimension_semantics = [#tpu.dimension_semantics<parallel>, #tpu.dimension_semantics<arbitrary>], iteration_bounds = array<i64: 2, 1>, scalar_prefetch = 0 : i64, scratch_operands = 2 : i64, tpu.core_type = #tpu.core_type<tc>, window_params = [{transform_indices = @transform_0, window_bounds = array<i64: 1, 8, 32>}, {transform_indices = @transform_1, window_bounds = array<i64: 1, 1, 8>}, {pipeline_mode = #tpu.pipeline_mode<synchronous>, transform_indices = @transform_2, window_bounds = array<i64: 32, 16>}, {pipeline_mode = #tpu.pipeline_mode<synchronous>, transform_indices = @transform_3, window_bounds = array<i64: 1, 16>}, {pipeline_mode = #tpu.pipeline_mode<synchronous>, transform_indices = @transform_4, window_bounds = array<i64: 1, 16>}, {pipeline_mode = #tpu.pipeline_mode<synchronous>, transform_indices = @transform_5, window_bounds = array<i64: 1, 1>}, {transform_indices = @transform_6, window_bounds = array<i64: 1, 1, 1>}]} {
    %c0_i32 = arith.constant 0 : i32
    %0 = arith.cmpi eq, %arg1, %c0_i32 : i32
    %1 = arith.extui %0 : i1 to i32
    %c0_i32_0 = arith.constant 0 : i32
    %2 = arith.cmpi ne, %1, %c0_i32_0 : i32
    scf.if %2 {
      %cst_19 = arith.constant 0.000000e+00 : f32
      %16 = vector.broadcast %cst_19 : f32 to vector<1x1x32xf32>
      %c0_20 = arith.constant 0 : index
      %c0_21 = arith.constant 0 : index
      %c0_22 = arith.constant 0 : index
      %17 = vector.load %arg9[%c0_20, %c0_21, %c0_22] : memref<1x1x32xf32, #tpu.memory_space<vmem>>, vector<1x1x32xf32>
      tpu.vector_store %arg9[%c0_20, %c0_21, %c0_22], %16 {strides = array<i32>} : memref<1x1x32xf32, #tpu.memory_space<vmem>>, vector<1x1x32xf32>,
      %cst_23 = arith.constant 0.000000e+00 : f32
      %18 = vector.broadcast %cst_23 : f32 to vector<1x1xf32>
      %c0_24 = arith.constant 0 : index
      %c0_25 = arith.constant 0 : index
      %19 = vector.load %arg10[%c0_24, %c0_25] : memref<1x1xf32, #tpu.memory_space<vmem>>, vector<1x1xf32>
      tpu.vector_store %arg10[%c0_24, %c0_25], %18 {strides = array<i32>} : memref<1x1xf32, #tpu.memory_space<vmem>>, vector<1x1xf32>,
    } else {
    }
    %c0 = arith.constant 0 : index
    %c0_1 = arith.constant 0 : index
    %c0_2 = arith.constant 0 : index
    %3 = vector.load %arg2[%c0, %c0_1, %c0_2] : memref<1x8x32xf32, #tpu.memory_space<vmem>>, vector<1x8x32xf32>
    %c0_3 = arith.constant 0 : index
    %c0_4 = arith.constant 0 : index
    %c0_5 = arith.constant 0 : index
    %4 = vector.load %arg3[%c0_3, %c0_4, %c0_5] : memref<1x1x8xf32, #tpu.memory_space<vmem>>, vector<1x1x8xf32>
    %c0_6 = arith.constant 0 : index
    %c0_7 = arith.constant 0 : index
    %c0_8 = arith.constant 0 : index
    %5 = vector.load %arg9[%c0_6, %c0_7, %c0_8] : memref<1x1x32xf32, #tpu.memory_space<vmem>>, vector<1x1x32xf32>
    "tpu.trace_start"() <{level = 10 : i32, message = "bks,bsh->bkh"}> : () -> ()
    %cst = arith.constant dense<0.000000e+00> : vector<1x1x32xf32>
    %6 = tpu.matmul %4, %3, %cst {dimension_numbers = #tpu.dot_dimension_numbers<[2], [1], [1], [2], [0, 0, 0, 1, 1, 2], [0], [0]>} : vector<1x1x8xf32>, vector<1x8x32xf32>, vector<1x1x32xf32> -> vector<1x1x32xf32>
    "tpu.trace_stop"() : () -> ()
    %7 = arith.addf %5, %6 : vector<1x1x32xf32>
    %c0_9 = arith.constant 0 : index
    %c0_10 = arith.constant 0 : index
    %c0_11 = arith.constant 0 : index
    %8 = vector.load %arg9[%c0_9, %c0_10, %c0_11] : memref<1x1x32xf32, #tpu.memory_space<vmem>>, vector<1x1x32xf32>
    tpu.vector_store %arg9[%c0_9, %c0_10, %c0_11], %7 {strides = array<i32>} : memref<1x1x32xf32, #tpu.memory_space<vmem>>, vector<1x1x32xf32>,
    %c0_12 = arith.constant 0 : index
    %c0_13 = arith.constant 0 : index
    %9 = vector.load %arg10[%c0_12, %c0_13] : memref<1x1xf32, #tpu.memory_space<vmem>>, vector<1x1xf32>
    %cst_14 = arith.constant dense<0.000000e+00> : vector<1x1xf32>
    %10 = vector.multi_reduction <add>, %4, %cst_14 [2] : vector<1x1x8xf32> to vector<1x1xf32>
    %11 = arith.addf %9, %10 : vector<1x1xf32>
    %c0_15 = arith.constant 0 : index
    %c0_16 = arith.constant 0 : index
    %12 = vector.load %arg10[%c0_15, %c0_16] : memref<1x1xf32, #tpu.memory_space<vmem>>, vector<1x1xf32>
    tpu.vector_store %arg10[%c0_15, %c0_16], %11 {strides = array<i32>} : memref<1x1xf32, #tpu.memory_space<vmem>>, vector<1x1xf32>,
    %c0_i32_17 = arith.constant 0 : i32
    %13 = arith.cmpi eq, %arg1, %c0_i32_17 : i32
    %14 = arith.extui %13 : i1 to i32
    %c0_i32_18 = arith.constant 0 : i32
    %15 = arith.cmpi ne, %14, %c0_i32_18 : i32
    scf.if %15 {
      %c0_19 = arith.constant 0 : index
      %c0_20 = arith.constant 0 : index
      %16 = vector.load %arg10[%c0_19, %c0_20] : memref<1x1xf32, #tpu.memory_space<vmem>>, vector<1x1xf32>
      %cst_21 = arith.constant 9.99999971E-10 : f32
      %17 = vector.broadcast %cst_21 : f32 to vector<1x1xf32>
      %18 = arith.maximumf %16, %17 : vector<1x1xf32>
      %c0_22 = arith.constant 0 : index
      %c0_23 = arith.constant 0 : index
      %c0_24 = arith.constant 0 : index
      %19 = vector.load %arg9[%c0_22, %c0_23, %c0_24] : memref<1x1x32xf32, #tpu.memory_space<vmem>>, vector<1x1x32xf32>
      %20 = vector.shape_cast %19 : vector<1x1x32xf32> to vector<1x32xf32>
      %21 = vector.broadcast %18 : vector<1x1xf32> to vector<1x32xf32>
      %22 = arith.divf %20, %21 : vector<1x32xf32>
      %c0_25 = arith.constant 0 : index
      %c0_26 = arith.constant 0 : index
      %23 = vector.load %arg4[%c0_25, %c0_26] : memref<32x16xf32, #tpu.memory_space<vmem>>, vector<32x16xf32>
      %cst_27 = arith.constant dense<0.000000e+00> : vector<1x16xf32>
      %24 = tpu.matmul %22, %23, %cst_27 {dimension_numbers = #tpu.dot_dimension_numbers<[1], [0], [0], [1], [0, 0, 1, 1], [], []>} : vector<1x32xf32>, vector<32x16xf32>, vector<1x16xf32> -> vector<1x16xf32>
      %c0_28 = arith.constant 0 : index
      %c0_29 = arith.constant 0 : index
      %25 = vector.load %arg5[%c0_28, %c0_29] : memref<1x16xf32, #tpu.memory_space<vmem>>, vector<1x16xf32>
      %26 = arith.addf %24, %25 : vector<1x16xf32>
      %27 = math.tanh %26 : vector<1x16xf32>
      %c0_30 = arith.constant 0 : index
      %c0_31 = arith.constant 0 : index
      %28 = vector.load %arg6[%c0_30, %c0_31] : memref<1x16xf32, #tpu.memory_space<vmem>>, vector<1x16xf32>
      %29 = arith.mulf %27, %28 : vector<1x16xf32>
      %cst_32 = arith.constant dense<0.000000e+00> : vector<1xf32>
      %30 = vector.multi_reduction <add>, %29, %cst_32 [1] : vector<1x16xf32> to vector<1xf32>
      %31 = vector.shape_cast %30 : vector<1xf32> to vector<1x1xf32>
      %c0_33 = arith.constant 0 : index
      %c0_34 = arith.constant 0 : index
      %32 = vector.load %arg7[%c0_33, %c0_34] : memref<1x1xf32, #tpu.memory_space<vmem>>, vector<1x1xf32>
      %33 = arith.addf %31, %32 : vector<1x1xf32>
      %34 = arith.negf %33 : vector<1x1xf32>
      %35 = math.exp %34 : vector<1x1xf32>
      %cst_35 = arith.constant 1.000000e+00 : f32
      %36 = vector.broadcast %cst_35 : f32 to vector<1x1xf32>
      %37 = arith.addf %36, %35 : vector<1x1xf32>
      %38 = arith.divf %36, %37 : vector<1x1xf32>
      %cst_36 = arith.constant 1.000000e+02 : f32
      %39 = vector.broadcast %cst_36 : f32 to vector<1x1xf32>
      %40 = arith.mulf %38, %39 : vector<1x1xf32>
      %41 = vector.shape_cast %40 : vector<1x1xf32> to vector<1x1x1xf32>
      %c0_37 = arith.constant 0 : index
      %c0_38 = arith.constant 0 : index
      %c0_39 = arith.constant 0 : index
      %42 = vector.load %arg8[%c0_37, %c0_38, %c0_39] : memref<1x1x1xf32, #tpu.memory_space<vmem>>, vector<1x1x1xf32>
      tpu.vector_store %arg8[%c0_37, %c0_38, %c0_39], %41 {strides = array<i32>} : memref<1x1x1xf32, #tpu.memory_space<vmem>>, vector<1x1x1xf32>,
    } else {
    }
    return
  }
  func.func @transform_0(%arg0: i32, %arg1: i32) -> (i32, i32, i32) {
    %c0_i32 = arith.constant 0 : i32
    %c0_i32_0 = arith.constant 0 : i32
    return %arg0, %arg1, %c0_i32 : i32, i32, i32
  }
  func.func @transform_1(%arg0: i32, %arg1: i32) -> (i32, i32, i32) {
    %c0_i32 = arith.constant 0 : i32
    %c0_i32_0 = arith.constant 0 : i32
    return %arg0, %c0_i32, %arg1 : i32, i32, i32
  }
  func.func @transform_2(%arg0: i32, %arg1: i32) -> (i32, i32) {
    %c0_i32 = arith.constant 0 : i32
    %c0_i32_0 = arith.constant 0 : i32
    %c0_i32_1 = arith.constant 0 : i32
    return %c0_i32, %c0_i32_0 : i32, i32
  }
  func.func @transform_3(%arg0: i32, %arg1: i32) -> (i32, i32) {
    %c0_i32 = arith.constant 0 : i32
    %c0_i32_0 = arith.constant 0 : i32
    %c0_i32_1 = arith.constant 0 : i32
    return %c0_i32, %c0_i32_0 : i32, i32
  }
  func.func @transform_4(%arg0: i32, %arg1: i32) -> (i32, i32) {
    %c0_i32 = arith.constant 0 : i32
    %c0_i32_0 = arith.constant 0 : i32
    %c0_i32_1 = arith.constant 0 : i32
    return %c0_i32, %c0_i32_0 : i32, i32
  }
  func.func @transform_5(%arg0: i32, %arg1: i32) -> (i32, i32) {
    %c0_i32 = arith.constant 0 : i32
    %c0_i32_0 = arith.constant 0 : i32
    %c0_i32_1 = arith.constant 0 : i32
    return %c0_i32, %c0_i32_0 : i32, i32
  }
  func.func @transform_6(%arg0: i32, %arg1: i32) -> (i32, i32, i32) {
    %c0_i32 = arith.constant 0 : i32
    %c0_i32_0 = arith.constant 0 : i32
    %c0_i32_1 = arith.constant 0 : i32
    return %arg0, %c0_i32, %c0_i32_0 : i32, i32, i32
  }
}

</mosaic_0001>

<bundles_post_ra>
// kernel: tpu_custom_call.1
= control target key start
LH: loop header
LB: loop body
LE: loop exit
PB: predicated region body
PF: predicated region fallthrough
CT: control target
= control target key end

     0   :  { %s717_s23 = smov 0   ;;  %s719_s24 = smov 0   ;;  %s781_s0 = inlined_call_operand.vmem [shape: f32[2,8,32], index: 0, kind: input, shape index: {}]   ;;  %s782_s1 = inlined_call_operand.vmem [shape: f32[2,1,8], index: 1, kind: input, shape index: {}]   ;;  %s783_s2 = inlined_call_operand.vmem [shape: f32[32,16], index: 2, kind: input, shape index: {}]   ;;  %s784_s3 = inlined_call_operand.vmem [shape: f32[1,16], index: 3, kind: input, shape index: {}]   ;;  %s785_s4 = inlined_call_operand.vmem [shape: f32[1,16], index: 4, kind: input, shape index: {}]   ;;  %s786_s5 = inlined_call_operand.<no memory space> [shape: f32[1,1], index: 5, kind: input, shape index: {}]   ;;  %s787_s6 = inlined_call_operand.vmem [shape: f32[2,1,1], index: 6, kind: output, shape index: {}]  }
   0x1   :  { %v11_v0 = vstv %s786_s5  ;;  %s721_s25 = smov 0  }
   0x2   :  { %12 = vst [vmem:[#allocation4] sm:$0x1] %v11_v0 }
   0x3 LB: > { %s30_s5 = sadd.s32 1, %s669_s24  ;;  %p578_p0 = scmp.ge.s32.totalorder %s673_s25, 1  ;;  %s673_s25 = sphi %s721_s25, %s18_s25   ;;  %s669_s24 = sphi %s719_s24, %s789_s24   ;;  %s665_s23 = sphi %s717_s23, %s788_s23  }
   0x4   : > { %p32_p1 = scmp.ge.s32.totalorder %s30_s5, 2  ;;  %p243_p2 = scmp.lt.s32.totalorder %s673_s25, 3 }
   0x6   : > { %s791_s5 = smov (%p32_p1, %s30_s5), 0  ;;  %p244_p3 = pnand %p578_p0, %p243_p2 }
   0x7   : > { %p279_p4 = scmp.lt.s32.totalorder (!%p244_p3), %s665_s23, 1  ;;  %v675_v1 = vmov (!%p244_p3), 0.0   ;;  %vm676_vm0 = vmmov (!%p244_p3), 0   ;;  %vm301_vm1 = vcmask (!%p244_p3), 0   ;;  %vm384_vm2 = vcmask (!%p244_p3), 57344   ;;  %v408_v11 = vld [vmem:[%s783_s2] sm:$0xff] (!%p244_p3) }
   0x8   : > { %247 = sbr.rel (%p244_p3) target bundleno = 717 (0x2cd), region = 44  ;;  %592 = vmatprep.subr.mxu0 (!%p244_p3), %v675_v1  ;;  %594 = vmatprep.mubr.msk.f32.mxu0 (!%p244_p3), %vm676_vm0, %v675_v1  ;;  %302 = vst.msk [vmem:[#allocation3] sm:$0x1] (!%p244_p3), %vm301_vm1, %v675_v1  ;;  %vm306_vm3 = vcmask (!%p244_p3), 64512   ;;  %v677_v5 = vmov (!%p244_p3), 0   ;;  %vm299_vm4 = vcmask (!%p244_p3), 253952   ;;  %v402_v22 = vlaneseq (!%p244_p3) }
   0x9   : > { %605 = vmatprep.mubr.msk.f32.mxu1 (!%p244_p3), %vm676_vm0, %v675_v1  ;;  %642 = vset.pattern.permute.xlu0 (!%p244_p3), %v677_v5  ;;  %300 = vst.msk [vmem:[#allocation2] sm:$0x1] (!%p244_p3), %vm299_vm4, %v675_v1  ;;  %v409_v12 = vld [vmem:[%s783_s2 + $0x8] sm:$0xff] (!%p244_p3)  ;;  %v678_v13 = vmov (!%p244_p3), 0.0|0.0   ;;  %v410_v15 = vld [vmem:[%s783_s2 + $0x10] sm:$0xff] (!%p244_p3)  ;;  %v411_v16 = vld [vmem:[%s783_s2 + $0x18] sm:$0xff] (!%p244_p3) }
   0xa   : > { %608 = vmatprep.subr.bf16.mxu1 (!%p244_p3), %v678_v13  ;;  %v609_v14 = vpack.c.bf16 (!%p244_p3), %v409_v12, %v408_v11  ;;  %v612_v17 = vpack.c.bf16 (!%p244_p3), %v411_v16, %v410_v15  ;;  %v403_v23 = vshrl.u32 (!%p244_p3), %v402_v22, 7  ;;  %vm413_vm5 = vcmask (!%p244_p3), 261120   ;;  %v412_v30 = vld [vmem:[%s784_s3] sm:$0x1] (!%p244_p3)  ;;  %v494_v38 = vld [vmem:[#allocation4] sm:$0x1] (!%p244_p3) }
   0xb   : > { %v488_v34 = vld [vmem:[%s785_s4] sm:$0x1] (!%p244_p3)  ;;  %vm490_vm6 = vcmask (!%p244_p3), 122880  }
   0xc   : > { %610 = vmatpush3.bf16.msra.mxu1 (!%p244_p3), %v609_v14  ;;  %v404_v24 = vsub.s32 (!%p244_p3), 0, %v403_v23 }
   0xd   : > { %611 = vmatprep.subr.bf16.mxu1 (!%p244_p3), %v678_v13 }
   0xf   : > { %s793_s23 = smov (!%p279_p4, %s665_s23), 1  ;;  %v383_v6 = vld [vmem:[#allocation3] sm:$0x1] }
  0x10   : > { %s291_s28 = scalar_lea.vmem %s782_s1, %s793_s23  ;;  %s579_s29 = sshll.u32 %s793_s23, 3  ;;  %613 = vmatpush3.bf16.msra.mxu1 %v612_v17  ;;  %v305_v18 = vld [vmem:[#allocation2] sm:$0x1] }
  0x11   : > { %v304_v2 = vld [vmem:[%s291_s28] sm:$0x1]  ;;  %s285_s8 = scalar_lea.vmem %s781_s0, %s579_s29  ;;  %s294_s26 = scalar_lea.vmem %s787_s6, %s793_s23 }
  0x12   : > { %v385_v3 = vsel %vm384_vm2, %v304_v2, 0.0  ;;  %v303_v4 = vld [vmem:[%s285_s8] sm:$0xff] }
  0x13   : > { %386 = vadd.xlane.f32.xlu0 %v385_v3  ;;  %593 = vmatpush3.msra.mxu0 %v303_v4 }
  0x14   : > { %595 = vmatmul.mubr.msk.f32.vlgmr.msra.gmra.mrb[0].mxu0 %vm306_vm3, %v304_v2 }
  0xa0   : > { %v387_v7 = vpop.xlane.xlu0 %386 }
  0xa1   : > { %v388_v8 = vadd.f32 %v387_v7, %v383_v6 }
  0xa3   : > { %390 = vst.msk [vmem:[#allocation3] sm:$0x1] %vm301_vm1, %v388_v8 }
  0xaa   : > { %v394_v9 = vld [vmem:[#allocation3] sm:$0x1] }
  0xab   : > { %v395_v10 = vmax.f32 %v394_v9, 1e-09 }
  0xad   : > { %399 = vperm.xlu0 %642, %v395_v10  }
  0xe7   : > { %v376_v19 = vpop.f32.mrb[0].mxu0 }
  0xe8   : > { %v380_v20 = vadd.f32 %v376_v19, %v305_v18  ;;  %v596_v21 = vpop.f32.mrb[1].mxu0 }
  0xea   : > { %382 = vst.msk [vmem:[#allocation2] sm:$0x1] %vm299_vm4, %v380_v20 }
  0xf1   : > { %v396_v27 = vld [vmem:[#allocation2] sm:$0x1] }
 0x12c   : > { %v400_v25 = vpop.permute.xlu0 %399 }
 0x12d   : > { %v405_v26 = vrot.slane %v400_v25, %v404_v24 }
 0x12f   : > { %643 = vrcp.f32 %v405_v26 }
 0x139   : > { %v644_v28 = vpop.eup %643 }
 0x13a   : > { %v407_v29 = vmul.f32 %v644_v28, %v396_v27 }
 0x13c   : > { %606 = vmatmul.mubr.msk.f32.vlgmr.msra.gmra.mrb[0].mxu1 %vm413_vm5, %v407_v29 }
 0x20f   : > { %v483_v31 = vpop.f32.mrb[0].mxu1 }
 0x210   : > { %v484_v32 = vadd.f32 %v483_v31, %v412_v30  ;;  %v607_v33 = vpop.f32.mrb[1].mxu1 }
 0x212   : > { %645 = vtanh.f32 %v484_v32 }
 0x21c   : > { %v646_v35 = vpop.eup %645 }
 0x21d   : > { %v489_v36 = vmul.f32 %v646_v35, %v488_v34 }
 0x21f   : > { %v491_v37 = vsel %vm490_vm6, %v489_v36, 0.0 }
 0x220   : > { %492 = vadd.xlane.f32.xlu1 %v491_v37 }
 0x2ad   : > { %v493_v39 = vpop.xlane.xlu1 %492 }
 0x2ae   : > { %v495_v40 = vadd.f32 %v494_v38, %v493_v39 }
 0x2b0   : > { %v582_v41 = vmul.f32 -1.442695, %v495_v40 }
 0x2b2   : > { %647 = vpow2.f32 %v582_v41 }
 0x2bc   : > { %v648_v42 = vpop.eup %647 }
 0x2bd   : > { %v499_v43 = vadd.f32 1.0, %v648_v42 }
 0x2bf   : > { %649 = vrcp.f32 %v499_v43 }
 0x2c9   : > { %v650_v44 = vpop.eup %649 }
 0x2ca   : > { %v502_v45 = vmul.f32 100.0, %v650_v44 }
 0x2cc   : > { %503 = vst.msk [vmem:[%s294_s26] sm:$0x1] %vm301_vm1, %v502_v45 }
 0x2cd PF: > { %s18_s25 = sadd.s32 1, %s673_s25   ;;  %s788_s23 = smov %s669_s24 }
 0x2ce   : > { %p15_p5 = scmp.ge.s32.totalorder %s18_s25, 4   ;;  %s789_s24 = smov %s791_s5 }
 0x2d0   :  { %17 = sbr.rel (!%p15_p5) target bundleno = 3 (0x3), region = 85 }

// kernel: tpu_custom_call.1
= control target key start
LH: loop header
LB: loop body
LE: loop exit
PB: predicated region body
PF: predicated region fallthrough
CT: control target
= control target key end

     0   :  { %s717_s23 = smov 0   ;;  %s719_s24 = smov 0   ;;  %s781_s0 = inlined_call_operand.vmem [shape: f32[2,8,32], index: 0, kind: input, shape index: {}]   ;;  %s782_s1 = inlined_call_operand.vmem [shape: f32[2,1,8], index: 1, kind: input, shape index: {}]   ;;  %s783_s2 = inlined_call_operand.vmem [shape: f32[32,16], index: 2, kind: input, shape index: {}]   ;;  %s784_s3 = inlined_call_operand.vmem [shape: f32[1,16], index: 3, kind: input, shape index: {}]   ;;  %s785_s4 = inlined_call_operand.vmem [shape: f32[1,16], index: 4, kind: input, shape index: {}]   ;;  %s786_s5 = inlined_call_operand.<no memory space> [shape: f32[1,1], index: 5, kind: input, shape index: {}]   ;;  %s787_s6 = inlined_call_operand.vmem [shape: f32[2,1,1], index: 6, kind: output, shape index: {}]  }
   0x1   :  { %v11_v0 = vstv %s786_s5  ;;  %s721_s25 = smov 0  }
   0x2   :  { %12 = vst [vmem:[#allocation4] sm:$0x1] %v11_v0 }
   0x3 LB: > { %s30_s5 = sadd.s32 1, %s669_s24  ;;  %p578_p0 = scmp.ge.s32.totalorder %s673_s25, 1  ;;  %s673_s25 = sphi %s721_s25, %s18_s25   ;;  %s669_s24 = sphi %s719_s24, %s789_s24   ;;  %s665_s23 = sphi %s717_s23, %s788_s23  }
   0x4   : > { %p32_p1 = scmp.ge.s32.totalorder %s30_s5, 2  ;;  %p243_p2 = scmp.lt.s32.totalorder %s673_s25, 3 }
   0x6   : > { %s791_s5 = smov (%p32_p1, %s30_s5), 0  ;;  %p244_p3 = pnand %p578_p0, %p243_p2 }
   0x7   : > { %p279_p4 = scmp.lt.s32.totalorder (!%p244_p3), %s665_s23, 1  ;;  %v675_v1 = vmov (!%p244_p3), 0.0   ;;  %vm676_vm0 = vmmov (!%p244_p3), 0   ;;  %vm301_vm1 = vcmask (!%p244_p3), 0   ;;  %vm384_vm2 = vcmask (!%p244_p3), 57344   ;;  %v408_v11 = vld [vmem:[%s783_s2] sm:$0xff] (!%p244_p3) }
   0x8   : > { %247 = sbr.rel (%p244_p3) target bundleno = 717 (0x2cd), region = 44  ;;  %592 = vmatprep.subr.mxu0 (!%p244_p3), %v675_v1  ;;  %594 = vmatprep.mubr.msk.f32.mxu0 (!%p244_p3), %vm676_vm0, %v675_v1  ;;  %302 = vst.msk [vmem:[#allocation3] sm:$0x1] (!%p244_p3), %vm301_vm1, %v675_v1  ;;  %vm306_vm3 = vcmask (!%p244_p3), 64512   ;;  %v677_v5 = vmov (!%p244_p3), 0   ;;  %vm299_vm4 = vcmask (!%p244_p3), 253952   ;;  %v402_v22 = vlaneseq (!%p244_p3) }
   0x9   : > { %605 = vmatprep.mubr.msk.f32.mxu1 (!%p244_p3), %vm676_vm0, %v675_v1  ;;  %642 = vset.pattern.permute.xlu0 (!%p244_p3), %v677_v5  ;;  %300 = vst.msk [vmem:[#allocation2] sm:$0x1] (!%p244_p3), %vm299_vm4, %v675_v1  ;;  %v409_v12 = vld [vmem:[%s783_s2 + $0x8] sm:$0xff] (!%p244_p3)  ;;  %v678_v13 = vmov (!%p244_p3), 0.0|0.0   ;;  %v410_v15 = vld [vmem:[%s783_s2 + $0x10] sm:$0xff] (!%p244_p3)  ;;  %v411_v16 = vld [vmem:[%s783_s2 + $0x18] sm:$0xff] (!%p244_p3) }
   0xa   : > { %608 = vmatprep.subr.bf16.mxu1 (!%p244_p3), %v678_v13  ;;  %v609_v14 = vpack.c.bf16 (!%p244_p3), %v409_v12, %v408_v11  ;;  %v612_v17 = vpack.c.bf16 (!%p244_p3), %v411_v16, %v410_v15  ;;  %v403_v23 = vshrl.u32 (!%p244_p3), %v402_v22, 7  ;;  %vm413_vm5 = vcmask (!%p244_p3), 261120   ;;  %v412_v30 = vld [vmem:[%s784_s3] sm:$0x1] (!%p244_p3)  ;;  %v494_v38 = vld [vmem:[#allocation4] sm:$0x1] (!%p244_p3) }
   0xb   : > { %v488_v34 = vld [vmem:[%s785_s4] sm:$0x1] (!%p244_p3)  ;;  %vm490_vm6 = vcmask (!%p244_p3), 122880  }
   0xc   : > { %610 = vmatpush3.bf16.msra.mxu1 (!%p244_p3), %v609_v14  ;;  %v404_v24 = vsub.s32 (!%p244_p3), 0, %v403_v23 }
   0xd   : > { %611 = vmatprep.subr.bf16.mxu1 (!%p244_p3), %v678_v13 }
   0xf   : > { %s793_s23 = smov (!%p279_p4, %s665_s23), 1  ;;  %v383_v6 = vld [vmem:[#allocation3] sm:$0x1] }
  0x10   : > { %s291_s28 = scalar_lea.vmem %s782_s1, %s793_s23  ;;  %s579_s29 = sshll.u32 %s793_s23, 3  ;;  %613 = vmatpush3.bf16.msra.mxu1 %v612_v17  ;;  %v305_v18 = vld [vmem:[#allocation2] sm:$0x1] }
  0x11   : > { %v304_v2 = vld [vmem:[%s291_s28] sm:$0x1]  ;;  %s285_s8 = scalar_lea.vmem %s781_s0, %s579_s29  ;;  %s294_s26 = scalar_lea.vmem %s787_s6, %s793_s23 }
  0x12   : > { %v385_v3 = vsel %vm384_vm2, %v304_v2, 0.0  ;;  %v303_v4 = vld [vmem:[%s285_s8] sm:$0xff] }
  0x13   : > { %386 = vadd.xlane.f32.xlu0 %v385_v3  ;;  %593 = vmatpush3.msra.mxu0 %v303_v4 }
  0x14   : > { %595 = vmatmul.mubr.msk.f32.vlgmr.msra.gmra.mrb[0].mxu0 %vm306_vm3, %v304_v2 }
  0xa0   : > { %v387_v7 = vpop.xlane.xlu0 %386 }
  0xa1   : > { %v388_v8 = vadd.f32 %v387_v7, %v383_v6 }
  0xa3   : > { %390 = vst.msk [vmem:[#allocation3] sm:$0x1] %vm301_vm1, %v388_v8 }
  0xaa   : > { %v394_v9 = vld [vmem:[#allocation3] sm:$0x1] }
  0xab   : > { %v395_v10 = vmax.f32 %v394_v9, 1e-09 }
  0xad   : > { %399 = vperm.xlu0 %642, %v395_v10  }
  0xe7   : > { %v376_v19 = vpop.f32.mrb[0].mxu0 }
  0xe8   : > { %v380_v20 = vadd.f32 %v376_v19, %v305_v18  ;;  %v596_v21 = vpop.f32.mrb[1].mxu0 }
  0xea   : > { %382 = vst.msk [vmem:[#allocation2] sm:$0x1] %vm299_vm4, %v380_v20 }
  0xf1   : > { %v396_v27 = vld [vmem:[#allocation2] sm:$0x1] }
 0x12c   : > { %v400_v25 = vpop.permute.xlu0 %399 }
 0x12d   : > { %v405_v26 = vrot.slane %v400_v25, %v404_v24 }
 0x12f   : > { %643 = vrcp.f32 %v405_v26 }
 0x139   : > { %v644_v28 = vpop.eup %643 }
 0x13a   : > { %v407_v29 = vmul.f32 %v644_v28, %v396_v27 }
 0x13c   : > { %606 = vmatmul.mubr.msk.f32.vlgmr.msra.gmra.mrb[0].mxu1 %vm413_vm5, %v407_v29 }
 0x20f   : > { %v483_v31 = vpop.f32.mrb[0].mxu1 }
 0x210   : > { %v484_v32 = vadd.f32 %v483_v31, %v412_v30  ;;  %v607_v33 = vpop.f32.mrb[1].mxu1 }
 0x212   : > { %645 = vtanh.f32 %v484_v32 }
 0x21c   : > { %v646_v35 = vpop.eup %645 }
 0x21d   : > { %v489_v36 = vmul.f32 %v646_v35, %v488_v34 }
 0x21f   : > { %v491_v37 = vsel %vm490_vm6, %v489_v36, 0.0 }
 0x220   : > { %492 = vadd.xlane.f32.xlu1 %v491_v37 }
 0x2ad   : > { %v493_v39 = vpop.xlane.xlu1 %492 }
 0x2ae   : > { %v495_v40 = vadd.f32 %v494_v38, %v493_v39 }
 0x2b0   : > { %v582_v41 = vmul.f32 -1.442695, %v495_v40 }
 0x2b2   : > { %647 = vpow2.f32 %v582_v41 }
 0x2bc   : > { %v648_v42 = vpop.eup %647 }
 0x2bd   : > { %v499_v43 = vadd.f32 1.0, %v648_v42 }
 0x2bf   : > { %649 = vrcp.f32 %v499_v43 }
 0x2c9   : > { %v650_v44 = vpop.eup %649 }
 0x2ca   : > { %v502_v45 = vmul.f32 100.0, %v650_v44 }
 0x2cc   : > { %503 = vst.msk [vmem:[%s294_s26] sm:$0x1] %vm301_vm1, %v502_v45 }
 0x2cd PF: > { %s18_s25 = sadd.s32 1, %s673_s25   ;;  %s788_s23 = smov %s669_s24 }
 0x2ce   : > { %p15_p5 = scmp.ge.s32.totalorder %s18_s25, 4   ;;  %s789_s24 = smov %s791_s5 }
 0x2d0   :  { %17 = sbr.rel (!%p15_p5) target bundleno = 3 (0x3), region = 85 }

</bundles_post_ra>
